<compile_context>
chip_gen: v7x
topology: tpu7x:2x2x1
jax: 0.10.0
libtpu: 0.0.40
codegen_flags: <defaults>
</compile_context>

<pallas_src>
import functools

import jax
import jax.numpy as jnp
from jax.experimental import pallas as pl
from jax.experimental.pallas import tpu as pltpu


# ----------------------------- Pallas kernel ------------------------------

def _feat(x):
    # elu(x) + 1  (alpha = 1):  x > 0 -> x + 1 ; x <= 0 -> exp(x)
    # exp argument clamped so the unselected branch never overflows to inf.
    return jnp.where(x > 0, x + 1.0, jnp.exp(jnp.minimum(x, 0.0)))


def linear_attention_kernel(eps, mask_ref, q_ref, k_ref, v_ref, o_ref):
    """One L-tile: q (TL, NC), k/v (S, NC), mask (NC, NC); NC = N*H*D.

    The mask is block-diagonal over (batch, head) groups of size D, which lets
    the whole multi-head, multi-batch attention be 3 full-width MXU matmuls.
    NOTE: if the grid tiles L, KV/Ksum are recomputed per tile — negligible at
    these sizes; at real sizes tile S instead with VMEM accumulators.
    """
    q = q_ref[...].astype(jnp.float32)           # (TL, NC)
    k = k_ref[...].astype(jnp.float32)           # (S,  NC)
    v = v_ref[...].astype(jnp.float32)           # (S,  NC)
    mask = mask_ref[...]                         # (NC, NC), f32 {0,1}

    Qf = _feat(q)                                # (TL, NC)
    Kf = _feat(k)                                # (S,  NC)

    # KV[(n,h,d),(n,h,v)] = sum_s K[n,s,h,d] * V[n,s,h,v]   (masked to same
    # (batch, head) block).  The reference's values/S and final *S cancel.
    KV = jnp.einsum('sc,sd->cd', Kf, v,
                    preferred_element_type=jnp.float32) * mask           # (NC, NC)

    Ksum = jnp.sum(Kf, axis=0, keepdims=True)                            # (1, NC)

    # Numerator:  num[l,(n,h,v)] = sum_d Q[n,l,h,d] * KV[(n,h,d),(n,h,v)]
    num = jnp.dot(Qf, KV, preferred_element_type=jnp.float32)            # (TL, NC)

    # Denominator, broadcast per (batch, head):
    #   den[l,(n,h,v)] = sum_{d in group} Q[n,l,h,d] * Ksum[(n,h,d)]
    den = jnp.dot(Qf * Ksum, mask,
                  preferred_element_type=jnp.float32) + eps              # (TL, NC)

    # EUP approximate reciprocal + one Newton step -> ~f32-exact divide.
    inv = pl.reciprocal(den, approx=True)
    inv = inv * (2.0 - den * inv)

    o_ref[...] = (num * inv).astype(o_ref.dtype)


def linear_attention(queries, keys, values, *, eps=1e-6, block_l=None):
    """queries: (N, L, H, D); keys/values: (N, S, H, D)  ->  (N, L, H, D)."""
    N, L, H, D = queries.shape
    _, S, _, _ = keys.shape
    C = H * D
    NC = N * C

    # Fold batch into the lane axis: channel index = (n*H + h)*D + d.
    # Wrapper-side layout plumbing (tiny tensors; outside the kernel).
    q2 = jnp.transpose(queries.reshape(N, L, C), (1, 0, 2)).reshape(L, NC)
    k2 = jnp.transpose(keys.reshape(N, S, C), (1, 0, 2)).reshape(S, NC)
    v2 = jnp.transpose(values.reshape(N, S, C), (1, 0, 2)).reshape(S, NC)

    # Constant block-diagonal (batch, head) mask, built once and kept
    # VMEM-resident across grid steps (constant block index in its BlockSpec).
    grp = jnp.arange(NC, dtype=jnp.int32) // D
    mask = (grp[:, None] == grp[None, :]).astype(jnp.float32)            # (NC, NC)

    # Tile L only when it is large; toy shapes collapse to a single grid step.
    if block_l is None:
        block_l = L if (L <= 128 or L % 128 != 0) else 128
    assert L % block_l == 0

    kernel = functools.partial(linear_attention_kernel, eps)

    out = pl.pallas_call(
        kernel,
        out_shape=jax.ShapeDtypeStruct((L, NC), queries.dtype),
        grid=(L // block_l,),
        in_specs=[
            pl.BlockSpec((NC, NC), lambda i: (0, 0)),        # mask (resident)
            pl.BlockSpec((block_l, NC), lambda i: (i, 0)),   # q tile
            pl.BlockSpec((S, NC), lambda i: (0, 0)),         # k (resident)
            pl.BlockSpec((S, NC), lambda i: (0, 0)),         # v (resident)
        ],
        out_specs=pl.BlockSpec((block_l, NC), lambda i: (i, 0)),
        compiler_params=pltpu.CompilerParams(
            dimension_semantics=("parallel",)),               # v7x: split L tiles over TCs
    )(mask, q2, k2, v2)

    # TODO(synk): at real widths (C > ~128) replace the (NC, NC) masked
    # contraction with a head-batched dot_general and tile S with VMEM
    # accumulators (v7x has only 64 MiB VMEM).

    return jnp.transpose(out.reshape(L, N, C), (1, 0, 2)).reshape(N, L, H, D)


# --------------------------- pure-JAX reference ----------------------------

def linear_attention_ref(queries, keys, values, eps=1e-6):
    Q = jax.nn.elu(queries) + 1.0
    K = jax.nn.elu(keys) + 1.0
    v_length = values.shape[1]
    vals = values / v_length
    KV = jnp.einsum('nshd,nshv->nhdv', K, vals)
    Z = 1.0 / (jnp.einsum('nlhd,nhd->nlh', Q, K.sum(axis=1)) + eps)
    return jnp.einsum('nlhd,nhdv,nlh->nlhv', Q, KV, Z) * v_length


# --------------------------------- main ------------------------------------

if __name__ == "__main__":
    key = jax.random.PRNGKey(0)
    kq, kk, kv = jax.random.split(key, 3)

    # Small shapes consistent with the module: [N, L, H, D] with hidden H*D = 32.
    N, L, S, H, D = 2, 16, 16, 8, 4
    q = jax.random.normal(kq, (N, L, H, D), jnp.float32)
    k = jax.random.normal(kk, (N, S, H, D), jnp.float32)
    v = jax.random.normal(kv, (N, S, H, D), jnp.float32)

    out = linear_attention(q, k, v)
    jax.block_until_ready(out)
    assert out.shape == (N, L, H, D)

    ref = linear_attention_ref(q, k, v)
    err = float(jnp.max(jnp.abs(out - ref)))
    # Newton-refined reciprocal restores ~f32 precision; tight tolerance again.
    assert err < 1e-3, f"max abs err {err}"

    print("KERNEL_OK")
</pallas_src>

<mosaic_0001>
module attributes {stable_mosaic.version = 11 : i64} {
  func.func @linear_attention_kernel(%arg0: i32, %arg1: memref<64x64xf32, #tpu.memory_space<vmem>>, %arg2: memref<16x64xf32, #tpu.memory_space<vmem>>, %arg3: memref<16x64xf32, #tpu.memory_space<vmem>>, %arg4: memref<16x64xf32, #tpu.memory_space<vmem>>, %arg5: memref<16x64xf32, #tpu.memory_space<vmem>>) attributes {dimension_semantics = [#tpu.dimension_semantics<parallel>], iteration_bounds = array<i64: 1>, scalar_prefetch = 0 : i64, scratch_operands = 0 : i64, tpu.core_type = #tpu.core_type<tc>, window_params = [{pipeline_mode = #tpu.pipeline_mode<synchronous>, transform_indices = @transform_0, window_bounds = array<i64: 64, 64>}, {transform_indices = @transform_1, window_bounds = array<i64: 16, 64>}, {pipeline_mode = #tpu.pipeline_mode<synchronous>, transform_indices = @transform_2, window_bounds = array<i64: 16, 64>}, {pipeline_mode = #tpu.pipeline_mode<synchronous>, transform_indices = @transform_3, window_bounds = array<i64: 16, 64>}, {transform_indices = @transform_4, window_bounds = array<i64: 16, 64>}]} {
    %c0 = arith.constant 0 : index
    %c0_0 = arith.constant 0 : index
    %0 = vector.load %arg2[%c0, %c0_0] : memref<16x64xf32, #tpu.memory_space<vmem>>, vector<16x64xf32>
    %c0_1 = arith.constant 0 : index
    %c0_2 = arith.constant 0 : index
    %1 = vector.load %arg3[%c0_1, %c0_2] : memref<16x64xf32, #tpu.memory_space<vmem>>, vector<16x64xf32>
    %c0_3 = arith.constant 0 : index
    %c0_4 = arith.constant 0 : index
    %2 = vector.load %arg4[%c0_3, %c0_4] : memref<16x64xf32, #tpu.memory_space<vmem>>, vector<16x64xf32>
    %c0_5 = arith.constant 0 : index
    %c0_6 = arith.constant 0 : index
    %3 = vector.load %arg1[%c0_5, %c0_6] : memref<64x64xf32, #tpu.memory_space<vmem>>, vector<64x64xf32>
    %cst = arith.constant 0.000000e+00 : f32
    %4 = vector.broadcast %cst : f32 to vector<16x64xf32>
    %5 = arith.cmpf ogt, %0, %4 : vector<16x64xf32>
    %cst_7 = arith.constant 1.000000e+00 : f32
    %6 = vector.broadcast %cst_7 : f32 to vector<16x64xf32>
    %7 = arith.addf %0, %6 : vector<16x64xf32>
    %cst_8 = arith.constant 0.000000e+00 : f32
    %8 = vector.broadcast %cst_8 : f32 to vector<16x64xf32>
    %9 = arith.minimumf %0, %8 : vector<16x64xf32>
    %10 = math.exp %9 : vector<16x64xf32>
    %11 = arith.select %5, %7, %10 : vector<16x64xi1>, vector<16x64xf32>
    %cst_9 = arith.constant 0.000000e+00 : f32
    %12 = vector.broadcast %cst_9 : f32 to vector<16x64xf32>
    %13 = arith.cmpf ogt, %1, %12 : vector<16x64xf32>
    %cst_10 = arith.constant 1.000000e+00 : f32
    %14 = vector.broadcast %cst_10 : f32 to vector<16x64xf32>
    %15 = arith.addf %1, %14 : vector<16x64xf32>
    %cst_11 = arith.constant 0.000000e+00 : f32
    %16 = vector.broadcast %cst_11 : f32 to vector<16x64xf32>
    %17 = arith.minimumf %1, %16 : vector<16x64xf32>
    %18 = math.exp %17 : vector<16x64xf32>
    %19 = arith.select %13, %15, %18 : vector<16x64xi1>, vector<16x64xf32>
    "tpu.trace_start"() <{level = 10 : i32, message = "sc,sd->cd"}> : () -> ()
    %cst_12 = arith.constant dense<0.000000e+00> : vector<64x64xf32>
    %20 = tpu.matmul %19, %2, %cst_12 {dimension_numbers = #tpu.dot_dimension_numbers<[0], [0], [1], [1], [0, 1, 1, 1], [], []>} : vector<16x64xf32>, vector<16x64xf32>, vector<64x64xf32> -> vector<64x64xf32>
    "tpu.trace_stop"() : () -> ()
    %21 = arith.mulf %20, %3 : vector<64x64xf32>
    %cst_13 = arith.constant dense<0.000000e+00> : vector<64xf32>
    %22 = vector.multi_reduction <add>, %19, %cst_13 [0] : vector<16x64xf32> to vector<64xf32>
    %23 = vector.shape_cast %22 : vector<64xf32> to vector<1x64xf32>
    %cst_14 = arith.constant dense<0.000000e+00> : vector<16x64xf32>
    %24 = tpu.matmul %11, %21, %cst_14 {dimension_numbers = #tpu.dot_dimension_numbers<[1], [0], [0], [1], [0, 0, 1, 1], [], []>} : vector<16x64xf32>, vector<64x64xf32>, vector<16x64xf32> -> vector<16x64xf32>
    %25 = vector.broadcast %23 : vector<1x64xf32> to vector<16x64xf32>
    %26 = arith.mulf %11, %25 : vector<16x64xf32>
    %cst_15 = arith.constant dense<0.000000e+00> : vector<16x64xf32>
    %27 = tpu.matmul %26, %3, %cst_15 {dimension_numbers = #tpu.dot_dimension_numbers<[1], [0], [0], [1], [0, 0, 1, 1], [], []>} : vector<16x64xf32>, vector<64x64xf32>, vector<16x64xf32> -> vector<16x64xf32>
    %cst_16 = arith.constant 9.99999997E-7 : f32
    %28 = vector.broadcast %cst_16 : f32 to vector<16x64xf32>
    %29 = arith.addf %27, %28 : vector<16x64xf32>
    %30 = tpu.reciprocal %29 {approx = true} : vector<16x64xf32> -> vector<16x64xf32>
    %31 = arith.mulf %29, %30 : vector<16x64xf32>
    %cst_17 = arith.constant 2.000000e+00 : f32
    %32 = vector.broadcast %cst_17 : f32 to vector<16x64xf32>
    %33 = arith.subf %32, %31 : vector<16x64xf32>
    %34 = arith.mulf %30, %33 : vector<16x64xf32>
    %35 = arith.mulf %24, %34 : vector<16x64xf32>
    %c0_18 = arith.constant 0 : index
    %c0_19 = arith.constant 0 : index
    %36 = vector.load %arg5[%c0_18, %c0_19] : memref<16x64xf32, #tpu.memory_space<vmem>>, vector<16x64xf32>
    tpu.vector_store %arg5[%c0_18, %c0_19], %35 {strides = array<i32>} : memref<16x64xf32, #tpu.memory_space<vmem>>, vector<16x64xf32>,
    return
  }
  func.func @transform_0(%arg0: i32) -> (i32, i32) {
    %c0_i32 = arith.constant 0 : i32
    %c0_i32_0 = arith.constant 0 : i32
    %c0_i32_1 = arith.constant 0 : i32
    return %c0_i32, %c0_i32_0 : i32, i32
  }
  func.func @transform_1(%arg0: i32) -> (i32, i32) {
    %c0_i32 = arith.constant 0 : i32
    %c0_i32_0 = arith.constant 0 : i32
    return %arg0, %c0_i32 : i32, i32
  }
  func.func @transform_2(%arg0: i32) -> (i32, i32) {
    %c0_i32 = arith.constant 0 : i32
    %c0_i32_0 = arith.constant 0 : i32
    %c0_i32_1 = arith.constant 0 : i32
    return %c0_i32, %c0_i32_0 : i32, i32
  }
  func.func @transform_3(%arg0: i32) -> (i32, i32) {
    %c0_i32 = arith.constant 0 : i32
    %c0_i32_0 = arith.constant 0 : i32
    %c0_i32_1 = arith.constant 0 : i32
    return %c0_i32, %c0_i32_0 : i32, i32
  }
  func.func @transform_4(%arg0: i32) -> (i32, i32) {
    %c0_i32 = arith.constant 0 : i32
    %c0_i32_0 = arith.constant 0 : i32
    return %arg0, %c0_i32 : i32, i32
  }
}

</mosaic_0001>

<bundles_post_ra>
// kernel: tpu_custom_call.1
= control target key start
LH: loop header
LB: loop body
LE: loop exit
PB: predicated region body
PF: predicated region fallthrough
CT: control target
= control target key end

     0   :  { %9 = vsyncpa [#allocation3], 0  ;;  %s925_s0 = inlined_call_operand.hbm [shape: f32[64,64], index: 0, kind: input, shape index: {}]   ;;  %s926_s1 = inlined_call_operand.hbm [shape: f32[16,64], index: 1, kind: input, shape index: {}]   ;;  %s927_s2 = inlined_call_operand.hbm [shape: f32[16,64], index: 2, kind: input, shape index: {}]   ;;  %s928_s3 = inlined_call_operand.hbm [shape: f32[16,64], index: 3, kind: input, shape index: {}]   ;;  %s929_s4 = inlined_call_operand.hbm [shape: f32[16,64], index: 4, kind: output, shape index: {}]  }
   0x1   :  { %10 = vsyncpa [#allocation6], 0 }
   0x2   :  { %11 = vsyncpa [#allocation9], 0 }
   0x3   :  { %12 = vsyncpa [#allocation4], 0  ;;  %s756_s15 = smov [#allocation5]   ;;  %s757_s17 = smov [#allocation2]  }
   0x4   :  { %s30_s16 = sshll.u32 %s756_s15, 4  ;;  %s18_s18 = sshll.u32 %s757_s17, 4  ;;  %s31_s16 = int_to_ptr.vmem [resolvable:$true] %s30_s16  ;;  %s788_s18 = int_to_ptr.vmem [resolvable:$true] %s18_s18 }
   0x5   :  { %s638_s21 = scalar_lea.hbm %s926_s1, 256 }
   0x6   :  { %p639_p0 = scmp.ne.s32.totalorder %s926_s1, %s638_s21  ;;  %p642_p1 = scmp.lt.u32.totalorder %s638_s21, %s926_s1 }
   0x8   :  { %p644_p2 = pnand %p642_p1, %p639_p0 }
   0xa   :  { %647 = shalt.err (!%p644_p2)
}
   0xb   :  { %s648_s26 = scalar_lea.vmem %s31_s16, 256  ;;  %p653_p4 = scmp.lt.s32.totalorder %s31_s16, %s31_s16 }
   0xc   :  { %p649_p3 = scmp.ne.s32.totalorder %s31_s16, %s648_s26  ;;  %p654_p5 = scmp.lt.s32.totalorder %s648_s26, %s648_s26 }
   0xe   :  { %p655_p6 = por %p654_p5, %p653_p4 }
  0x10   :  { %p656_p7 = pnand %p655_p6, %p649_p3 }
  0x12   :  { %659 = shalt.err (!%p656_p7)
}
  0x13   :  { %s758_s27 = smov 128   ;;  %s759_s28 = smov 8  }
  0x14   :  { %36 = dma.hbm_to_vmem [thread:$0]  %s926_s1, 256, %s31_s16, [#allocation6], %s758_s27, %s758_s27, %s759_s28  }
  0x15   :  { %s660_s7 = scalar_lea.hbm %s925_s0, 1024 }
  0x16   :  { %p661_p8 = scmp.ne.s32.totalorder %s925_s0, %s660_s7  ;;  %p664_p9 = scmp.lt.u32.totalorder %s660_s7, %s925_s0 }
  0x18   :  { %p666_p10 = pnand %p664_p9, %p661_p8 }
  0x1a   :  { %669 = shalt.err (!%p666_p10)
}
  0x1b   :  { %s670_s12 = scalar_lea.vmem %s788_s18, 1024  ;;  %p675_p12 = scmp.lt.s32.totalorder %s788_s18, %s788_s18 }
  0x1c   :  { %p671_p11 = scmp.ne.s32.totalorder %s788_s18, %s670_s12  ;;  %p676_p13 = scmp.lt.s32.totalorder %s670_s12, %s670_s12 }
  0x1e   :  { %p677_p0 = por %p676_p13, %p675_p12 }
  0x20   :  { %p678_p1 = pnand %p677_p0, %p671_p11 }
  0x22   :  { %681 = shalt.err (!%p678_p1)
}
  0x23   :  { %24 = dma.hbm_to_vmem [thread:$0]  %s925_s0, 1024, %s788_s18, [#allocation3], %s758_s27, %s758_s27, %s759_s28  }
  0x24   :  { %s760_s14 = smov [#allocation7]   ;;  %s761_s16 = smov [#allocation8]  }
  0x25   :  { %s42_s15 = sshll.u32 %s760_s14, 4  ;;  %s54_s17 = sshll.u32 %s761_s16, 4  ;;  %s43_s15 = int_to_ptr.vmem [resolvable:$true] %s42_s15  ;;  %s825_s17 = int_to_ptr.vmem [resolvable:$true] %s54_s17 }
  0x26   :  { %s682_s21 = scalar_lea.hbm %s927_s2, 256 }
  0x27   :  { %p683_p2 = scmp.ne.s32.totalorder %s927_s2, %s682_s21  ;;  %p686_p3 = scmp.lt.u32.totalorder %s682_s21, %s927_s2 }
  0x29   :  { %p688_p4 = pnand %p686_p3, %p683_p2 }
  0x2b   :  { %691 = shalt.err (!%p688_p4)
}
  0x2c   :  { %s692_s0 = scalar_lea.vmem %s43_s15, 256  ;;  %p697_p6 = scmp.lt.s32.totalorder %s43_s15, %s43_s15 }
  0x2d   :  { %p693_p5 = scmp.ne.s32.totalorder %s43_s15, %s692_s0  ;;  %p698_p7 = scmp.lt.s32.totalorder %s692_s0, %s692_s0 }
  0x2f   :  { %p699_p8 = por %p698_p7, %p697_p6 }
  0x31   :  { %p700_p9 = pnand %p699_p8, %p693_p5 }
  0x33   :  { %703 = shalt.err (!%p700_p9)
}
  0x34   :  { %48 = dma.hbm_to_vmem [thread:$0]  %s927_s2, 256, %s43_s15, [#allocation6], %s758_s27, %s758_s27, %s759_s28  }
  0x35   :  { %s704_s5 = scalar_lea.hbm %s928_s3, 256 }
  0x36   :  { %p705_p10 = scmp.ne.s32.totalorder %s928_s3, %s704_s5  ;;  %p708_p11 = scmp.lt.u32.totalorder %s704_s5, %s928_s3 }
  0x38   :  { %p710_p12 = pnand %p708_p11, %p705_p10 }
  0x3a   :  { %713 = shalt.err (!%p710_p12)
}
  0x3b   :  { %s714_s10 = scalar_lea.vmem %s825_s17, 256  ;;  %p719_p0 = scmp.lt.s32.totalorder %s825_s17, %s825_s17 }
  0x3c   :  { %p715_p13 = scmp.ne.s32.totalorder %s825_s17, %s714_s10  ;;  %p720_p1 = scmp.lt.s32.totalorder %s714_s10, %s714_s10 }
  0x3e   :  { %p721_p2 = por %p720_p1, %p719_p0 }
  0x40   :  { %p722_p3 = pnand %p721_p2, %p715_p13 }
  0x42   :  { %725 = shalt.err (!%p722_p3)
}
  0x43   :  { %60 = dma.hbm_to_vmem [thread:$0]  %s928_s3, 256, %s825_s17, [#allocation9], %s758_s27, %s758_s27, %s759_s28  }
  0x44   :  { %748 = dma.done.wait [#allocation3], 1024  }
  0x45   :  { %749 = vsyncadd [#allocation3], 4294966272 }
  0x46   :  { %750 = dma.done.wait [#allocation6], 512  }
  0x47   :  { %751 = vsyncadd [#allocation6], 4294966784 }
  0x48   :  { %752 = dma.done.wait [#allocation9], 256  }
  0x49   :  { %753 = vsyncadd [#allocation9], 4294967040  ;;  %v75_v0 = vld [vmem:[#allocation7] sm:$0xff]  ;;  %v76_v1 = vld [vmem:[#allocation7 + $0x8] sm:$0xff]  ;;  %vm281_vm1 = vcmask 523264   ;;  %vm143_vm3 = vcmask 130048  }
  0x4a   :  { %v103_v2 = vmin.f32 %v75_v0, 0.0  ;;  %v104_v3 = vmin.f32 %v76_v1, 0.0  ;;  %v101_v6 = vadd.f32 1.0, %v75_v0  ;;  %vm99_vm0 = vcmp.gt.f32.partialorder %v75_v0, 0.0  ;;  %v77_v9 = vld [vmem:[#allocation8] sm:$0xff]  ;;  %v78_v10 = vld [vmem:[#allocation8 + $0x8] sm:$0xff] }
  0x4b   :  { %v102_v7 = vadd.f32 1.0, %v76_v1  ;;  %vm100_vm2 = vcmp.gt.f32.partialorder %v76_v1, 0.0  ;;  %v582_v13 = vpack.c.bf16 %v78_v10, %v77_v9  ;;  %v864_v18 = vld [vmem:[#allocation2] sm:$0xff]  ;;  %v866_v19 = vld [vmem:[#allocation2 + $0x8] sm:$0xff]  ;;  %v870_v22 = vld [vmem:[#allocation2 + $0x10] sm:$0xff]  ;;  %s762_s3 = smov [#allocation10]  }
  0x4c   :  { %v105_v4 = vmul.f32 1.442695, %v103_v2  ;;  %v107_v5 = vmul.f32 1.442695, %v104_v3  ;;  %v602_v20 = vpack.c.bf16 %v866_v19, %v864_v18  ;;  %v872_v23 = vld [vmem:[#allocation2 + $0x18] sm:$0xff]  ;;  %v877_v26 = vld [vmem:[#allocation2 + $0x20] sm:$0xff] }
  0x4d   :  { %583 = vmatprep.subr.bf16.mxu0 %v582_v13  ;;  %v606_v24 = vpack.c.bf16 %v872_v23, %v870_v22  ;;  %v879_v27 = vld [vmem:[#allocation2 + $0x28] sm:$0xff]  ;;  %v884_v30 = vld [vmem:[#allocation2 + $0x30] sm:$0xff]  ;;  %v886_v31 = vld [vmem:[#allocation2 + $0x38] sm:$0xff]  ;;  %s472_s12 = sshll.u32 %s762_s3, 4  ;;  %s473_s12 = int_to_ptr.vmem [resolvable:$true] %s472_s12 }
  0x4e   :  { %626 = vpow2.f32 %v105_v4  ;;  %585 = vmatpush3.bf16.msra.mxu0 %v582_v13  ;;  %v610_v28 = vpack.c.bf16 %v879_v27, %v877_v26  ;;  %v614_v32 = vpack.c.bf16 %v886_v31, %v884_v30  ;;  %v74_v38 = vld [vmem:[#allocation5 + $0x8] sm:$0xff]  ;;  %v73_v44 = vld [vmem:[#allocation5] sm:$0xff]  ;;  %s726_s1 = scalar_lea.vmem %s473_s12, 256  ;;  %p731_p5 = scmp.lt.s32.totalorder %s473_s12, %s473_s12 }
  0x4f   :  { %628 = vpow2.f32 %v107_v5  ;;  %603 = vmatprep.subr.bf16.mxu0 %v602_v20  ;;  %v92_v39 = vmin.f32 %v74_v38, 0.0  ;;  %v91_v45 = vmin.f32 %v73_v44, 0.0  ;;  %v90_v49 = vadd.f32 1.0, %v74_v38  ;;  %p727_p4 = scmp.ne.s32.totalorder %s473_s12, %s726_s1  ;;  %p732_p6 = scmp.lt.s32.totalorder %s726_s1, %s726_s1 }
  0x50   :  { %vm88_vm4 = vcmp.gt.f32.partialorder %v74_v38, 0.0  ;;  %v89_v53 = vadd.f32 1.0, %v73_v44  ;;  %vm87_vm5 = vcmp.gt.f32.partialorder %v73_v44, 0.0 }
  0x51   :  { %v95_v41 = vmul.f32 1.442695, %v92_v39  ;;  %v93_v46 = vmul.f32 1.442695, %v91_v45  ;;  %p733_p7 = por %p732_p6, %p731_p5 }
  0x53   :  { %630 = vpow2.f32 %v95_v41  ;;  %p734_p8 = pnand %p733_p7, %p727_p4 }
  0x54   :  { %632 = vpow2.f32 %v93_v46 }
  0x58   :  { %v627_v8 = vpop.eup %626 }
  0x59   :  { %v629_v11 = vpop.eup %628  ;;  %v109_v12 = vsel %vm99_vm0, %v101_v6, %v627_v8 }
  0x5a   :  { %111 = vxpose.xlu0.b32.start [1/2] (short) (narrow) %v109_v12, 64  ;;  %v282_v14 = vsel %vm281_vm1, %v109_v12, 0.0  ;;  %v110_v15 = vsel %vm100_vm2, %v102_v7, %v629_v11 }
  0x5b   :  { %v283_v16 = vsel %vm281_vm1, %v110_v15, 0.0 }
  0x5c   :  { %v284_v17 = vadd.f32 %v283_v16, %v282_v14 }
  0x5d   :  { %v631_v50 = vpop.eup %630 }
  0x5e   :  { %112 = vxpose.xlu0.b32.end [2/2] (short) (narrow) %v110_v15, 64  ;;  %v285_v40 = vrot.slane %v284_v17, 4  ;;  %v98_v52 = vsel %vm88_vm4, %v90_v49, %v631_v50  ;;  %v633_v54 = vpop.eup %632 }
  0x5f   :  { %v97_v56 = vsel %vm87_vm5, %v89_v53, %v633_v54 }
  0x60   :  { %v286_v42 = vadd.f32 %v285_v40, %v284_v17  ;;  %560 = vmatprep.mubr.msk.f32.mxu1 %vm281_vm1, %v97_v56 }
  0x62   :  { %v287_v43 = vrot.slane %v286_v42, 2 }
  0x64   :  { %v288_v47 = vadd.f32 %v287_v43, %v286_v42 }
  0x66   :  { %v289_v48 = vrot.slane %v288_v47, 1 }
  0x68   :  { %v290_v51 = vadd.f32 %v289_v48, %v288_v47 }
  0x6a   :  { %v373_v55 = vmul.f32 %v290_v51, %v98_v52  ;;  %v372_v57 = vmul.f32 %v290_v51, %v97_v56 }
  0xda   :  { %v127_v21 = vpop.trf.xlu0 }
  0xdb   :  { %532 = vmatprep.mubr.msk.f32.mxu0 %vm143_vm3, %v127_v21 }
  0xde   :  { %v128_v25 = vpop.trf.xlu0 }
  0xdf   :  { %533 = vmatmul.mubr.msk.f32.vlgmr.msra.gmra.mrb[0].mxu0 %vm143_vm3, %v128_v25 }
  0xe0   :  { %605 = vmatpush3.bf16.msra.mxu0 %v602_v20 }
  0xe1   :  { %607 = vmatprep.subr.bf16.mxu0 %v606_v24 }
  0xe2   :  { %v129_v29 = vpop.trf.xlu0 }
  0xe3   :  { %535 = vmatprep.mubr.msk.f32.mxu0 %vm143_vm3, %v129_v29 }
  0xe4   :  { %609 = vmatpush3.bf16.msra.mxu0 %v606_v24 }
  0xe5   :  { %611 = vmatprep.subr.bf16.mxu0 %v610_v28 }
  0xe6   :  { %v130_v33 = vpop.trf.xlu0 }
  0xe7   :  { %536 = vmatmul.mubr.msk.f32.gmra.mrb[2].mxu0 %vm143_vm3, %v130_v33 }
  0xe8   :  { %613 = vmatpush3.bf16.msra.mxu0 %v610_v28 }
  0xe9   :  { %615 = vmatprep.subr.bf16.mxu0 %v614_v32 }
  0xea   :  { %v131_v34 = vpop.trf.xlu0 }
  0xeb   :  { %538 = vmatprep.mubr.msk.f32.mxu0 %vm143_vm3, %v131_v34 }
  0xec   :  { %617 = vmatpush3.bf16.msra.mxu0 %v614_v32 }
  0xee   :  { %v132_v35 = vpop.trf.xlu0 }
  0xef   :  { %539 = vmatmul.mubr.msk.f32.gmra.mrb[4].mxu0 %vm143_vm3, %v132_v35 }
  0xf2   :  { %v133_v36 = vpop.trf.xlu0 }
  0xf3   :  { %541 = vmatprep.mubr.msk.f32.mxu0 %vm143_vm3, %v133_v36 }
  0xf6   :  { %v134_v37 = vpop.trf.xlu0 }
  0xf7   :  { %542 = vmatmul.mubr.msk.f32.gmra.mrb[6].mxu0 %vm143_vm3, %v134_v37 }
  0xf8   :  { %579 = vmatprep.mubr.msk.f32.mxu0 %vm281_vm1, %v372_v57 }
  0xfb   :  { %580 = vmatmul.mubr.msk.f32.vlgmr.msra.gmra.mrb[8].mxu0 %vm281_vm1, %v373_v55 }
 0x1b2   :  { %v534_v58 = vpop.f32.mrb[0].mxu0 }
 0x1b3   :  { %v274_v59 = vmul.f32 %v534_v58, %v866_v19  ;;  %v234_v60 = vpop.f32.mrb[1].mxu0 }
 0x1b4   :  { %v273_v61 = vmul.f32 %v234_v60, %v864_v18 }
 0x1b6   :  { %v586_v62 = vpack.c.bf16 %v274_v59, %v273_v61 }
 0x1b8   :  { %587 = vmatprep.subr.bf16.mxu1 %v586_v62 }
 0x1b9   :  { %589 = vmatpush3.bf16.msra.mxu1 %v586_v62 }
 0x1ba   :  { %v537_v63 = vpop.f32.mrb[2].mxu0 }
 0x1bb   :  { %v276_v0 = vmul.f32 %v537_v63, %v872_v23  ;;  %v244_v1 = vpop.f32.mrb[3].mxu0 }
 0x1bc   :  { %v275_v2 = vmul.f32 %v244_v1, %v870_v22 }
 0x1be   :  { %v590_v3 = vpack.c.bf16 %v276_v0, %v275_v2 }
 0x1c0   :  { %591 = vmatprep.subr.bf16.mxu1 %v590_v3 }
 0x1c1   :  { %593 = vmatpush3.bf16.msra.mxu1 %v590_v3 }
 0x1c2   :  { %v540_v4 = vpop.f32.mrb[4].mxu0 }
 0x1c3   :  { %v278_v5 = vmul.f32 %v540_v4, %v879_v27  ;;  %v254_v6 = vpop.f32.mrb[5].mxu0 }
 0x1c4   :  { %v277_v7 = vmul.f32 %v254_v6, %v877_v26 }
 0x1c6   :  { %v594_v8 = vpack.c.bf16 %v278_v5, %v277_v7 }
 0x1c8   :  { %595 = vmatprep.subr.bf16.mxu1 %v594_v8 }
 0x1c9   :  { %597 = vmatpush3.bf16.msra.mxu1 %v594_v8 }
 0x1ca   :  { %v543_v9 = vpop.f32.mrb[6].mxu0 }
 0x1cb   :  { %v280_v10 = vmul.f32 %v543_v9, %v886_v31  ;;  %v264_v11 = vpop.f32.mrb[7].mxu0 }
 0x1cc   :  { %v279_v12 = vmul.f32 %v264_v11, %v884_v30 }
 0x1ce   :  { %v598_v13 = vpack.c.bf16 %v280_v10, %v279_v12  ;;  %v581_v14 = vpop.f32.mrb[8].mxu0 }
 0x1cf   :  { %v446_v15 = vpop.f32.mrb[9].mxu0  ;;  %v452_v16 = vadd.f32 1e-06, %v581_v14 }
 0x1d0   :  { %599 = vmatprep.subr.bf16.mxu1 %v598_v13  ;;  %v447_v17 = vadd.f32 1e-06, %v446_v15 }
 0x1d1   :  { %601 = vmatpush3.bf16.msra.mxu1 %v598_v13  ;;  %634 = vrcp.f32 %v452_v16 }
 0x1d2   :  { %636 = vrcp.f32 %v447_v17 }
 0x1d4   :  { %561 = vmatmul.mubr.msk.f32.vlgmr.msra.gmra.mrb[0].mxu1 %vm281_vm1, %v98_v52 }
 0x1db   :  { %v635_v18 = vpop.eup %634 }
 0x1dc   :  { %v637_v19 = vpop.eup %636  ;;  %v458_v20 = vmul.f32 %v635_v18, %v452_v16 }
 0x1dd   :  { %v457_v21 = vmul.f32 %v637_v19, %v447_v17 }
 0x1de   :  { %v460_v22 = vsub.f32 2.0, %v458_v20 }
 0x1df   :  { %v459_v23 = vsub.f32 2.0, %v457_v21 }
 0x1e0   :  { %v462_v24 = vmul.f32 %v635_v18, %v460_v22 }
 0x1e1   :  { %v461_v26 = vmul.f32 %v637_v19, %v459_v23 }
 0x2a7   :  { %v562_v25 = vpop.f32.mrb[0].mxu1 }
 0x2a8   :  { %v464_v27 = vmul.f32 %v562_v25, %v462_v24  ;;  %v363_v28 = vpop.f32.mrb[1].mxu1 }
 0x2a9   :  { %v463_v29 = vmul.f32 %v461_v26, %v363_v28 }
 0x2aa   :  { %466 = vst.msk [vmem:[#allocation10 + $0x8] sm:$0xff] %vm281_vm1, %v464_v27 }
 0x2ab   :  { %465 = vst.msk [vmem:[#allocation10] sm:$0xff] %vm281_vm1, %v463_v29 }
 0x2ac   :  { %737 = shalt.err (!%p734_p8)
}
 0x2ad   :  { %s738_s15 = scalar_lea.hbm %s929_s4, 256 }
 0x2ae   :  { %p739_p9 = scmp.ne.s32.totalorder %s929_s4, %s738_s15  ;;  %p742_p10 = scmp.lt.u32.totalorder %s738_s15, %s929_s4 }
 0x2b0   :  { %p744_p11 = pnand %p742_p10, %p739_p9 }
 0x2b2   :  { %747 = shalt.err (!%p744_p11)
}
 0x2b3   :  { %478 = dma.vmem_to_hbm [thread:$0]  %s473_s12, 256, %s929_s4, [#allocation4], %s758_s27, %s758_s27, %s759_s28  }
 0x2b4   :  { %754 = dma.done.wait [#allocation4], 256  }
 0x2b5   :  { %755 = vsyncadd [#allocation4], 4294967040 }
 0x2b6   :  { %482 = vsyncpa [#allocation3], 1 }
 0x2b7   :  { %483 = vsyncpa [#allocation6], 1 }
 0x2b8   :  { %484 = vsyncpa [#allocation9], 1 }
 0x2b9   :  { %485 = vsyncpa [#allocation4], 1 }

</bundles_post_ra>
